<compile_context>
chip_gen: v6e
topology: v6e:2x2x1
jax: 0.10.0
libtpu: 0.0.40
codegen_flags: <defaults>
</compile_context>

<pallas_src>
import jax
import jax.numpy as jnp
from jax.experimental import pallas as pl
from jax.experimental.pallas import tpu as pltpu

_LANE = 128      # vreg lane width
_SUBLANE = 8     # f32 vreg sublane count


def _round_up(x, m):
    return (x + m - 1) // m * m


def _linear_kernel(w_ref, b_ref, x_ref, o_ref):
    # w_ref / b_ref are (1, 1) scalars in SMEM; x_ref / o_ref are (TR, C)
    # VMEM tiles.  A single f32 scalar-broadcast FMA on the VPU — no MXU.
    w = w_ref[0, 0]
    b = b_ref[0, 0]
    o_ref[...] = (x_ref[...] * w + b).astype(o_ref.dtype)


def linear_regression_forward(x, weight, bias, *, lane_width=512, block_rows=512):
    """y = x @ weight.T + bias with weight (1,1), bias (1,), x (N,1).

    Repacks x into a lane-dense (rows, C) slab (C multiple of 128, rows an
    exact multiple of the row tile), streams it through a tiled,
    double-buffered Pallas pipeline, and slices the result back to (N, 1).
    """
    n, f = x.shape
    assert f == 1, "LinearRegression expects in_features == 1"
    out_dtype = x.dtype

    w = jnp.asarray(weight, jnp.float32).reshape(1, 1)
    b = jnp.asarray(bias, jnp.float32).reshape(1, 1)

    # ---- lane-dense 2-D layout ---------------------------------------------
    c = min(_round_up(lane_width, _LANE), _round_up(max(n, 1), _LANE))
    rows_needed = pl.cdiv(n, c)

    # Row tile: multiple of 8 sublanes, no bigger than what the data needs.
    tr = min(_round_up(block_rows, _SUBLANE), _round_up(rows_needed, _SUBLANE))
    # Pad rows to an exact multiple of tr -> every block is full-width and
    # full-height: unmasked vst, no edge blocks.
    rows = _round_up(rows_needed, tr)
    total = rows * c

    xf = x.reshape(-1)
    if total != n:
        xf = jnp.pad(xf, (0, total - n))             # at most one extra tile
    x2 = xf.reshape(rows, c)

    grid = (rows // tr,)

    y2 = pl.pallas_call(
        _linear_kernel,
        out_shape=jax.ShapeDtypeStruct((rows, c), out_dtype),
        grid_spec=pltpu.PrefetchScalarGridSpec(
            num_scalar_prefetch=0,
            grid=grid,
            in_specs=[
                pl.BlockSpec(memory_space=pltpu.SMEM),       # weight scalar
                pl.BlockSpec(memory_space=pltpu.SMEM),       # bias scalar
                pl.BlockSpec((tr, c), lambda i: (i, 0)),     # x tile
            ],
            out_specs=pl.BlockSpec((tr, c), lambda i: (i, 0)),
        ),
        compiler_params=pltpu.CompilerParams(
            # Row tiles are independent -> megacore-shard the stream on v7x.
            dimension_semantics=("parallel",),
        ),
    )(w, b, x2)

    return y2.reshape(-1)[:n].reshape(n, 1)


if __name__ == "__main__":
    key = jax.random.PRNGKey(0)
    kx, kw, kb, kx2 = jax.random.split(key, 4)

    # nn.Linear(1, 1) init: fan_in == 1 -> uniform(-1, 1).
    weight = jax.random.uniform(kw, (1, 1), minval=-1.0, maxval=1.0,
                                dtype=jnp.float32)
    bias = jax.random.uniform(kb, (1,), minval=-1.0, maxval=1.0,
                              dtype=jnp.float32)

    # Small batch consistent with the module (single (8, 128) block).
    x_small = jax.random.normal(kx, (8, 1), dtype=jnp.float32)
    y_small = jax.block_until_ready(linear_regression_forward(x_small, weight, bias))
    assert y_small.shape == (8, 1)
    assert jnp.allclose(y_small, x_small @ weight.T + bias, atol=1e-6), \
        "small-batch mismatch vs reference"

    # Larger ragged batch: exercises padding, the lane-dense repack and the
    # multi-step double-buffered pipeline (all blocks full, no edge masking).
    x_big = jax.random.normal(kx2, (100_003, 1), dtype=jnp.float32)
    y_big = jax.block_until_ready(
        linear_regression_forward(x_big, weight, bias,
                                  lane_width=256, block_rows=64))
    assert y_big.shape == x_big.shape
    assert jnp.allclose(y_big, x_big @ weight.T + bias, atol=1e-6), \
        "large-batch mismatch vs reference"

    print("KERNEL_OK")
</pallas_src>

<mosaic_0001>
module attributes {stable_mosaic.version = 11 : i64} {
  func.func @_linear_kernel(%arg0: i32, %arg1: memref<1x1xf32, #tpu.memory_space<smem>>, %arg2: memref<1x1xf32, #tpu.memory_space<smem>>, %arg3: memref<8x128xf32, #tpu.memory_space<vmem>>, %arg4: memref<8x128xf32, #tpu.memory_space<vmem>>) attributes {dimension_semantics = [#tpu.dimension_semantics<parallel>], iteration_bounds = array<i64: 1>, scalar_prefetch = 0 : i64, scratch_operands = 0 : i64, tpu.core_type = #tpu.core_type<tc>, window_params = [{transform_indices = @transform_0, window_bounds = array<i64: 1, 1>}, {transform_indices = @transform_1, window_bounds = array<i64: 1, 1>}, {transform_indices = @transform_2, window_bounds = array<i64: 8, 128>}, {transform_indices = @transform_3, window_bounds = array<i64: 8, 128>}]} {
    %c0 = arith.constant 0 : index
    %c0_0 = arith.constant 0 : index
    %0 = memref.load %arg1[%c0, %c0_0] : memref<1x1xf32, #tpu.memory_space<smem>>
    %c0_1 = arith.constant 0 : index
    %c0_2 = arith.constant 0 : index
    %1 = memref.load %arg2[%c0_1, %c0_2] : memref<1x1xf32, #tpu.memory_space<smem>>
    %c0_3 = arith.constant 0 : index
    %c0_4 = arith.constant 0 : index
    %2 = vector.load %arg3[%c0_3, %c0_4] : memref<8x128xf32, #tpu.memory_space<vmem>>, vector<8x128xf32>
    %3 = vector.broadcast %0 : f32 to vector<8x128xf32>
    %4 = arith.mulf %2, %3 : vector<8x128xf32>
    %5 = vector.broadcast %1 : f32 to vector<8x128xf32>
    %6 = arith.addf %4, %5 : vector<8x128xf32>
    %c0_5 = arith.constant 0 : index
    %c0_6 = arith.constant 0 : index
    %7 = vector.load %arg4[%c0_5, %c0_6] : memref<8x128xf32, #tpu.memory_space<vmem>>, vector<8x128xf32>
    tpu.vector_store %arg4[%c0_5, %c0_6], %6 {strides = array<i32>} : memref<8x128xf32, #tpu.memory_space<vmem>>, vector<8x128xf32>,
    return
  }
  func.func @transform_0(%arg0: i32) -> (i32, i32) {
    %c0_i32 = arith.constant 0 : i32
    %c0_i32_0 = arith.constant 0 : i32
    %c0_i32_1 = arith.constant 0 : i32
    return %c0_i32, %c0_i32_0 : i32, i32
  }
  func.func @transform_1(%arg0: i32) -> (i32, i32) {
    %c0_i32 = arith.constant 0 : i32
    %c0_i32_0 = arith.constant 0 : i32
    %c0_i32_1 = arith.constant 0 : i32
    return %c0_i32, %c0_i32_0 : i32, i32
  }
  func.func @transform_2(%arg0: i32) -> (i32, i32) {
    %c0_i32 = arith.constant 0 : i32
    %c0_i32_0 = arith.constant 0 : i32
    return %arg0, %c0_i32 : i32, i32
  }
  func.func @transform_3(%arg0: i32) -> (i32, i32) {
    %c0_i32 = arith.constant 0 : i32
    %c0_i32_0 = arith.constant 0 : i32
    return %arg0, %c0_i32 : i32, i32
  }
}

</mosaic_0001>

<bundles_post_ra>
// kernel: tpu_custom_call.1
= control target key start
LH: loop header
LB: loop body
LE: loop exit
PB: predicated region body
PF: predicated region fallthrough
CT: control target
= control target key end

     0   :  { %10 = vsyncpa [#allocation5], 0  ;;  %s132_s0 = inlined_call_operand.<no memory space> [shape: f32[1,1], index: 0, kind: input, shape index: {}]   ;;  %s133_s1 = inlined_call_operand.<no memory space> [shape: f32[1,1], index: 1, kind: input, shape index: {}]   ;;  %s134_s2 = inlined_call_operand.hbm [shape: f32[8,128], index: 2, kind: input, shape index: {}]   ;;  %s135_s3 = inlined_call_operand.hbm [shape: f32[8,128], index: 3, kind: output, shape index: {}]  }
   0x1   :  { %11 = vsyncpa [#allocation6], 0  ;;  %s98_s12 = smov [#allocation4]  }
   0x2   :  { %s22_s13 = sshll.u32 %s98_s12, 4  ;;  %s23_s13 = int_to_ptr.vmem [resolvable:$true] %s22_s13 }
   0x3   :  { %s62_s14 = scalar_lea.vmem %s23_s13, 128  ;;  %p67_p1 = scmp.lt.s32.totalorder %s23_s13, %s23_s13 }
   0x4   :  { %p63_p0 = scmp.ne.s32.totalorder %s23_s13, %s62_s14  ;;  %p68_p2 = scmp.lt.s32.totalorder %s62_s14, %s62_s14 }
   0x6   :  { %p69_p3 = por %p68_p2, %p67_p1 }
   0x8   :  { %p70_p4 = pnand %p69_p3, %p63_p0 }
   0xa   :  { %73 = shalt.err (!%p70_p4)
}
   0xb   :  { %25 = dma.hbm_to_vmem [thread:$0]  %s134_s2, 128, %s23_s13, [#allocation5]  }
   0xc   :  { %94 = dma.done.wait [#allocation5], 128  }
   0xd   :  { %95 = vsyncadd [#allocation5], 4294967168  ;;  %v32_v0 = vstv %s132_s0  ;;  %v31_v1 = vld [vmem:[#allocation4] sm:$0xff]  ;;  %v34_v2 = vstv %s133_s1  ;;  %s99_s21 = smov [#allocation7]  }
   0xe   :  { %s43_s22 = sshll.u32 %s99_s21, 4  ;;  %v33_v3 = vmul.f32 %v32_v0, %v31_v1  ;;  %s44_s22 = int_to_ptr.vmem [resolvable:$true] %s43_s22 }
   0xf   :  { %s74_s23 = scalar_lea.vmem %s44_s22, 128  ;;  %p79_p6 = scmp.lt.s32.totalorder %s44_s22, %s44_s22 }
  0x10   :  { %v35_v4 = vadd.f32 %v34_v2, %v33_v3  ;;  %p75_p5 = scmp.ne.s32.totalorder %s44_s22, %s74_s23  ;;  %p80_p7 = scmp.lt.s32.totalorder %s74_s23, %s74_s23 }
  0x12   :  { %36 = vst [vmem:[#allocation7] sm:$0xff] %v35_v4  ;;  %p81_p8 = por %p80_p7, %p79_p6 }
  0x14   :  { %p82_p9 = pnand %p81_p8, %p75_p5 }
  0x16   :  { %85 = shalt.err (!%p82_p9)
}
  0x17   :  { %46 = dma.vmem_to_hbm [thread:$0]  %s44_s22, 128, %s135_s3, [#allocation6]  }
  0x18   :  { %96 = dma.done.wait [#allocation6], 128  }
  0x19   :  { %97 = vsyncadd [#allocation6], 4294967168 }
  0x1a   :  { %50 = vsyncpa [#allocation5], 1 }
  0x1b   :  { %51 = vsyncpa [#allocation6], 1 }

</bundles_post_ra>
